<compile_context>
chip_gen: v7x
topology: tpu7x:2x2x1
jax: 0.10.0
libtpu: 0.0.40
codegen_flags: <defaults>
</compile_context>

<pallas_src>
import jax
import jax.numpy as jnp
from jax.experimental import pallas as pl
from jax.experimental.pallas import tpu as pltpu

BN_EPS = 1e-5


# ---------------------------------------------------------------------------
# Fused kernel: (BN + ReLU) block stack + flatten + Linear classifier.
# ---------------------------------------------------------------------------
def _fused_blocks_classifier_kernel(x_ref, ss_ref, w_ref, b_ref, o_ref, acc_ref):
    # x_ref  : (bn, bc, S)   activation tile (NCHW viewed as (N, C, H*W))
    # ss_ref : (L, bc, 2)    folded BN (scale, shift) per block, per channel
    # w_ref  : (bc, S, M)    classifier weight slice for this channel tile
    # b_ref  : (1, M)        classifier bias
    # o_ref  : (bn, M)       logits
    # acc_ref: (bn, M) f32   VMEM accumulator over channel tiles
    j = pl.program_id(1)                       # channel-tile (reduction) axis

    @pl.when(j == 0)
    def _():
        acc_ref[...] = jnp.zeros_like(acc_ref)

    # Apply the whole block stack in-register on this tile.
    y = x_ref[...]                             # (bn, bc, S) f32
    ss = ss_ref[...]                           # (L, bc, 2)
    for l in range(ss_ref.shape[0]):           # static, unrolled over blocks
        scale = ss[l:l + 1, :, 0:1]            # (1, bc, 1)
        shift = ss[l:l + 1, :, 1:2]            # (1, bc, 1)
        y = jnp.maximum(y * scale + shift, 0.0)

    # Contract this channel tile against its weight slice on the MXU.
    # out[n, m] += sum_c sum_s y[n, c, s] * w[c, s, m]
    partial = jnp.dot(y[:, 0, :], w_ref[0],
                      preferred_element_type=jnp.float32)
    for c in range(1, y.shape[1]):             # static, unrolled over channels
        partial = partial + jnp.dot(y[:, c, :], w_ref[c],
                                    preferred_element_type=jnp.float32)
    acc_ref[...] += partial

    @pl.when(j == pl.num_programs(1) - 1)
    def _():
        o_ref[...] = (acc_ref[...] + b_ref[...]).astype(o_ref.dtype)


def _pick_channel_tile(C, S, M, *, max_unroll=32, w_tile_budget=4 << 20):
    """Pick a channel tile: a multiple-of-8 divisor of C (or C itself)."""
    cands = [d for d in range(8, C + 1, 8) if C % d == 0 and d <= max_unroll]
    for d in sorted(cands, reverse=True):
        # keep the double-buffered weight slice within a modest VMEM budget
        if 2 * d * S * M * 4 <= w_tile_budget:
            return d
    if cands:
        return cands[0]
    return C                                   # fallback: single full-C tile


# ---------------------------------------------------------------------------
# Full network forward.
# ---------------------------------------------------------------------------
def basic_blockwise_convnet_forward(x_nchw, block_params, w, b,
                                    channel_block=None):
    """x_nchw: (N, C, H, W); block_params: [(gamma, beta, mean, var)] per block;
    w: (C*H*W, M); b: (M,)."""
    N, C, H, Wsp = x_nchw.shape
    S = H * Wsp
    K, M = w.shape
    assert K == C * S, (K, C, S)
    L = len(block_params)
    assert L >= 1, "expects at least one block"

    # Free views of contiguous memory -- no transposes, no copies of substance.
    x3 = x_nchw.reshape(N, C, S).astype(jnp.float32)
    w3 = w.reshape(C, S, M).astype(jnp.float32)

    # Fold each block's inference BatchNorm into per-channel (scale, shift),
    # packed as one (L, C, 2) array (one small DMA per channel tile).
    folded = []
    for gamma, beta, mean, var in block_params:
        s = gamma.astype(jnp.float32) * jax.lax.rsqrt(
            var.astype(jnp.float32) + BN_EPS)
        t = beta.astype(jnp.float32) - mean.astype(jnp.float32) * s
        folded.append(jnp.stack([s, t], axis=-1))      # (C, 2)
    ss = jnp.stack(folded, axis=0)                      # (L, C, 2)
    b2 = b.reshape(1, M).astype(jnp.float32)

    # Tile selection.
    bn = N if N <= 256 else 256                # batch rows per MXU LHS tile
    bc = channel_block if channel_block is not None else _pick_channel_tile(
        C, S, M)
    assert C % bc == 0 and (bc % 8 == 0 or bc == C), (C, bc)

    grid = (pl.cdiv(N, bn), C // bc)           # (parallel, reduction)

    out = pl.pallas_call(
        _fused_blocks_classifier_kernel,
        out_shape=jax.ShapeDtypeStruct((N, M), jnp.float32),
        grid_spec=pltpu.PrefetchScalarGridSpec(
            num_scalar_prefetch=0,
            grid=grid,
            in_specs=[
                pl.BlockSpec((bn, bc, S), lambda i, j: (i, j, 0)),
                pl.BlockSpec((L, bc, 2), lambda i, j: (0, j, 0)),
                pl.BlockSpec((bc, S, M), lambda i, j: (j, 0, 0)),
                pl.BlockSpec((1, M), lambda i, j: (0, 0)),
            ],
            out_specs=pl.BlockSpec((bn, M), lambda i, j: (i, 0)),
            scratch_shapes=[pltpu.VMEM((bn, M), jnp.float32)],
        ),
        compiler_params=pltpu.CompilerParams(
            dimension_semantics=("parallel", "arbitrary")),
    )(x3, ss, w3, b2)

    return out


if __name__ == "__main__":
    N, C, H, W = 2, 16, 16, 16
    num_blocks = 2
    num_classes = 10
    feat = C * H * W

    key = jax.random.PRNGKey(0)
    keys = jax.random.split(key, 3 + 4 * num_blocks)
    x = jax.random.normal(keys[0], (N, C, H, W), dtype=jnp.float32)

    block_params = []
    for bi in range(num_blocks):
        kg, kb, km, kv = keys[1 + 4 * bi: 5 + 4 * bi]
        gamma = 1.0 + 0.1 * jax.random.normal(kg, (C,), dtype=jnp.float32)
        beta = 0.1 * jax.random.normal(kb, (C,), dtype=jnp.float32)
        mean = 0.05 * jax.random.normal(km, (C,), dtype=jnp.float32)
        var = 1.0 + 0.1 * jnp.abs(jax.random.normal(kv, (C,), dtype=jnp.float32))
        block_params.append((gamma, beta, mean, var))

    kw, kbias = keys[1 + 4 * num_blocks], keys[2 + 4 * num_blocks]
    w = 0.02 * jax.random.normal(kw, (feat, num_classes), dtype=jnp.float32)
    bias = 0.01 * jax.random.normal(kbias, (num_classes,), dtype=jnp.float32)

    # channel_block=8 -> two reduction steps over C=16, exercising the
    # accumulator init / finalize path.
    out = basic_blockwise_convnet_forward(x, block_params, w, bias,
                                          channel_block=8)
    out = jax.block_until_ready(out)

    # Pure-JAX reference (same math, NCHW broadcasting, high-precision matmul).
    ref = x
    for gamma, beta, mean, var in block_params:
        ref = (ref - mean[None, :, None, None]) * jax.lax.rsqrt(
            var[None, :, None, None] + BN_EPS)
        ref = ref * gamma[None, :, None, None] + beta[None, :, None, None]
        ref = jnp.maximum(ref, 0.0)
    ref = jnp.dot(ref.reshape(N, -1), w,
                  precision=jax.lax.Precision.HIGHEST) + bias

    assert out.shape == (N, num_classes)
    max_err = float(jnp.max(jnp.abs(out - ref)))
    assert jnp.allclose(out, ref, atol=5e-3, rtol=5e-3), max_err
    print("KERNEL_OK")
</pallas_src>

<mosaic_0001>
module attributes {stable_mosaic.version = 11 : i64} {
  func.func @_fused_blocks_classifier_kernel(%arg0: i32, %arg1: i32, %arg2: memref<2x8x256xf32, #tpu.memory_space<vmem>>, %arg3: memref<2x8x2xf32, #tpu.memory_space<vmem>>, %arg4: memref<8x256x10xf32, #tpu.memory_space<vmem>>, %arg5: memref<1x10xf32, #tpu.memory_space<vmem>>, %arg6: memref<2x10xf32, #tpu.memory_space<vmem>>, %arg7: memref<2x10xf32, #tpu.memory_space<vmem>>) attributes {dimension_semantics = [#tpu.dimension_semantics<parallel>, #tpu.dimension_semantics<arbitrary>], iteration_bounds = array<i64: 1, 2>, scalar_prefetch = 0 : i64, scratch_operands = 1 : i64, tpu.core_type = #tpu.core_type<tc>, window_params = [{transform_indices = @transform_0, window_bounds = array<i64: 2, 8, 256>}, {transform_indices = @transform_1, window_bounds = array<i64: 2, 8, 2>}, {transform_indices = @transform_2, window_bounds = array<i64: 8, 256, 10>}, {pipeline_mode = #tpu.pipeline_mode<synchronous>, transform_indices = @transform_3, window_bounds = array<i64: 1, 10>}, {transform_indices = @transform_4, window_bounds = array<i64: 2, 10>}]} {
    %c0_i32 = arith.constant 0 : i32
    %0 = arith.cmpi eq, %arg1, %c0_i32 : i32
    %1 = arith.extui %0 : i1 to i32
    %c0_i32_0 = arith.constant 0 : i32
    %2 = arith.cmpi ne, %1, %c0_i32_0 : i32
    scf.if %2 {
      %cst_37 = arith.constant 0.000000e+00 : f32
      %74 = vector.broadcast %cst_37 : f32 to vector<2x10xf32>
      %c0_38 = arith.constant 0 : index
      %c0_39 = arith.constant 0 : index
      %75 = vector.load %arg7[%c0_38, %c0_39] : memref<2x10xf32, #tpu.memory_space<vmem>>, vector<2x10xf32>
      tpu.vector_store %arg7[%c0_38, %c0_39], %74 {strides = array<i32>} : memref<2x10xf32, #tpu.memory_space<vmem>>, vector<2x10xf32>,
    } else {
    }
    %c0 = arith.constant 0 : index
    %c0_1 = arith.constant 0 : index
    %c0_2 = arith.constant 0 : index
    %3 = vector.load %arg2[%c0, %c0_1, %c0_2] : memref<2x8x256xf32, #tpu.memory_space<vmem>>, vector<2x8x256xf32>
    %c0_3 = arith.constant 0 : index
    %c0_4 = arith.constant 0 : index
    %c0_5 = arith.constant 0 : index
    %4 = vector.load %arg3[%c0_3, %c0_4, %c0_5] : memref<2x8x2xf32, #tpu.memory_space<vmem>>, vector<2x8x2xf32>
    %5 = vector.extract_strided_slice %4 {offsets = [0, 0, 0], sizes = [1, 8, 1], strides = [1, 1, 1]} : vector<2x8x2xf32> to vector<1x8x1xf32>
    %6 = vector.extract_strided_slice %4 {offsets = [0, 0, 1], sizes = [1, 8, 1], strides = [1, 1, 1]} : vector<2x8x2xf32> to vector<1x8x1xf32>
    %7 = vector.broadcast %5 : vector<1x8x1xf32> to vector<2x8x256xf32>
    %8 = arith.mulf %3, %7 : vector<2x8x256xf32>
    %9 = vector.broadcast %6 : vector<1x8x1xf32> to vector<2x8x256xf32>
    %10 = arith.addf %8, %9 : vector<2x8x256xf32>
    %cst = arith.constant 0.000000e+00 : f32
    %11 = vector.broadcast %cst : f32 to vector<2x8x256xf32>
    %12 = arith.maximumf %10, %11 : vector<2x8x256xf32>
    %13 = vector.extract_strided_slice %4 {offsets = [1, 0, 0], sizes = [1, 8, 1], strides = [1, 1, 1]} : vector<2x8x2xf32> to vector<1x8x1xf32>
    %14 = vector.extract_strided_slice %4 {offsets = [1, 0, 1], sizes = [1, 8, 1], strides = [1, 1, 1]} : vector<2x8x2xf32> to vector<1x8x1xf32>
    %15 = vector.broadcast %13 : vector<1x8x1xf32> to vector<2x8x256xf32>
    %16 = arith.mulf %12, %15 : vector<2x8x256xf32>
    %17 = vector.broadcast %14 : vector<1x8x1xf32> to vector<2x8x256xf32>
    %18 = arith.addf %16, %17 : vector<2x8x256xf32>
    %cst_6 = arith.constant 0.000000e+00 : f32
    %19 = vector.broadcast %cst_6 : f32 to vector<2x8x256xf32>
    %20 = arith.maximumf %18, %19 : vector<2x8x256xf32>
    %21 = vector.extract_strided_slice %20 {offsets = [0, 0, 0], sizes = [2, 1, 256], strides = [1, 1, 1]} : vector<2x8x256xf32> to vector<2x1x256xf32>
    %22 = vector.shape_cast %21 : vector<2x1x256xf32> to vector<2x256xf32>
    %c0_7 = arith.constant 0 : index
    %c0_8 = arith.constant 0 : index
    %c0_9 = arith.constant 0 : index
    %23 = vector.load %arg4[%c0_7, %c0_8, %c0_9] : memref<8x256x10xf32, #tpu.memory_space<vmem>>, vector<1x256x10xf32>
    %24 = vector.shape_cast %23 : vector<1x256x10xf32> to vector<256x10xf32>
    %cst_10 = arith.constant dense<0.000000e+00> : vector<2x10xf32>
    %25 = tpu.matmul %22, %24, %cst_10 {dimension_numbers = #tpu.dot_dimension_numbers<[1], [0], [0], [1], [0, 0, 1, 1], [], []>} : vector<2x256xf32>, vector<256x10xf32>, vector<2x10xf32> -> vector<2x10xf32>
    %26 = vector.extract_strided_slice %20 {offsets = [0, 1, 0], sizes = [2, 1, 256], strides = [1, 1, 1]} : vector<2x8x256xf32> to vector<2x1x256xf32>
    %27 = vector.shape_cast %26 : vector<2x1x256xf32> to vector<2x256xf32>
    %c1 = arith.constant 1 : index
    %c0_11 = arith.constant 0 : index
    %c0_12 = arith.constant 0 : index
    %28 = vector.load %arg4[%c1, %c0_11, %c0_12] : memref<8x256x10xf32, #tpu.memory_space<vmem>>, vector<1x256x10xf32>
    %29 = vector.shape_cast %28 : vector<1x256x10xf32> to vector<256x10xf32>
    %cst_13 = arith.constant dense<0.000000e+00> : vector<2x10xf32>
    %30 = tpu.matmul %27, %29, %cst_13 {dimension_numbers = #tpu.dot_dimension_numbers<[1], [0], [0], [1], [0, 0, 1, 1], [], []>} : vector<2x256xf32>, vector<256x10xf32>, vector<2x10xf32> -> vector<2x10xf32>
    %31 = arith.addf %25, %30 : vector<2x10xf32>
    %32 = vector.extract_strided_slice %20 {offsets = [0, 2, 0], sizes = [2, 1, 256], strides = [1, 1, 1]} : vector<2x8x256xf32> to vector<2x1x256xf32>
    %33 = vector.shape_cast %32 : vector<2x1x256xf32> to vector<2x256xf32>
    %c2 = arith.constant 2 : index
    %c0_14 = arith.constant 0 : index
    %c0_15 = arith.constant 0 : index
    %34 = vector.load %arg4[%c2, %c0_14, %c0_15] : memref<8x256x10xf32, #tpu.memory_space<vmem>>, vector<1x256x10xf32>
    %35 = vector.shape_cast %34 : vector<1x256x10xf32> to vector<256x10xf32>
    %cst_16 = arith.constant dense<0.000000e+00> : vector<2x10xf32>
    %36 = tpu.matmul %33, %35, %cst_16 {dimension_numbers = #tpu.dot_dimension_numbers<[1], [0], [0], [1], [0, 0, 1, 1], [], []>} : vector<2x256xf32>, vector<256x10xf32>, vector<2x10xf32> -> vector<2x10xf32>
    %37 = arith.addf %31, %36 : vector<2x10xf32>
    %38 = vector.extract_strided_slice %20 {offsets = [0, 3, 0], sizes = [2, 1, 256], strides = [1, 1, 1]} : vector<2x8x256xf32> to vector<2x1x256xf32>
    %39 = vector.shape_cast %38 : vector<2x1x256xf32> to vector<2x256xf32>
    %c3 = arith.constant 3 : index
    %c0_17 = arith.constant 0 : index
    %c0_18 = arith.constant 0 : index
    %40 = vector.load %arg4[%c3, %c0_17, %c0_18] : memref<8x256x10xf32, #tpu.memory_space<vmem>>, vector<1x256x10xf32>
    %41 = vector.shape_cast %40 : vector<1x256x10xf32> to vector<256x10xf32>
    %cst_19 = arith.constant dense<0.000000e+00> : vector<2x10xf32>
    %42 = tpu.matmul %39, %41, %cst_19 {dimension_numbers = #tpu.dot_dimension_numbers<[1], [0], [0], [1], [0, 0, 1, 1], [], []>} : vector<2x256xf32>, vector<256x10xf32>, vector<2x10xf32> -> vector<2x10xf32>
    %43 = arith.addf %37, %42 : vector<2x10xf32>
    %44 = vector.extract_strided_slice %20 {offsets = [0, 4, 0], sizes = [2, 1, 256], strides = [1, 1, 1]} : vector<2x8x256xf32> to vector<2x1x256xf32>
    %45 = vector.shape_cast %44 : vector<2x1x256xf32> to vector<2x256xf32>
    %c4 = arith.constant 4 : index
    %c0_20 = arith.constant 0 : index
    %c0_21 = arith.constant 0 : index
    %46 = vector.load %arg4[%c4, %c0_20, %c0_21] : memref<8x256x10xf32, #tpu.memory_space<vmem>>, vector<1x256x10xf32>
    %47 = vector.shape_cast %46 : vector<1x256x10xf32> to vector<256x10xf32>
    %cst_22 = arith.constant dense<0.000000e+00> : vector<2x10xf32>
    %48 = tpu.matmul %45, %47, %cst_22 {dimension_numbers = #tpu.dot_dimension_numbers<[1], [0], [0], [1], [0, 0, 1, 1], [], []>} : vector<2x256xf32>, vector<256x10xf32>, vector<2x10xf32> -> vector<2x10xf32>
    %49 = arith.addf %43, %48 : vector<2x10xf32>
    %50 = vector.extract_strided_slice %20 {offsets = [0, 5, 0], sizes = [2, 1, 256], strides = [1, 1, 1]} : vector<2x8x256xf32> to vector<2x1x256xf32>
    %51 = vector.shape_cast %50 : vector<2x1x256xf32> to vector<2x256xf32>
    %c5 = arith.constant 5 : index
    %c0_23 = arith.constant 0 : index
    %c0_24 = arith.constant 0 : index
    %52 = vector.load %arg4[%c5, %c0_23, %c0_24] : memref<8x256x10xf32, #tpu.memory_space<vmem>>, vector<1x256x10xf32>
    %53 = vector.shape_cast %52 : vector<1x256x10xf32> to vector<256x10xf32>
    %cst_25 = arith.constant dense<0.000000e+00> : vector<2x10xf32>
    %54 = tpu.matmul %51, %53, %cst_25 {dimension_numbers = #tpu.dot_dimension_numbers<[1], [0], [0], [1], [0, 0, 1, 1], [], []>} : vector<2x256xf32>, vector<256x10xf32>, vector<2x10xf32> -> vector<2x10xf32>
    %55 = arith.addf %49, %54 : vector<2x10xf32>
    %56 = vector.extract_strided_slice %20 {offsets = [0, 6, 0], sizes = [2, 1, 256], strides = [1, 1, 1]} : vector<2x8x256xf32> to vector<2x1x256xf32>
    %57 = vector.shape_cast %56 : vector<2x1x256xf32> to vector<2x256xf32>
    %c6 = arith.constant 6 : index
    %c0_26 = arith.constant 0 : index
    %c0_27 = arith.constant 0 : index
    %58 = vector.load %arg4[%c6, %c0_26, %c0_27] : memref<8x256x10xf32, #tpu.memory_space<vmem>>, vector<1x256x10xf32>
    %59 = vector.shape_cast %58 : vector<1x256x10xf32> to vector<256x10xf32>
    %cst_28 = arith.constant dense<0.000000e+00> : vector<2x10xf32>
    %60 = tpu.matmul %57, %59, %cst_28 {dimension_numbers = #tpu.dot_dimension_numbers<[1], [0], [0], [1], [0, 0, 1, 1], [], []>} : vector<2x256xf32>, vector<256x10xf32>, vector<2x10xf32> -> vector<2x10xf32>
    %61 = arith.addf %55, %60 : vector<2x10xf32>
    %62 = vector.extract_strided_slice %20 {offsets = [0, 7, 0], sizes = [2, 1, 256], strides = [1, 1, 1]} : vector<2x8x256xf32> to vector<2x1x256xf32>
    %63 = vector.shape_cast %62 : vector<2x1x256xf32> to vector<2x256xf32>
    %c7 = arith.constant 7 : index
    %c0_29 = arith.constant 0 : index
    %c0_30 = arith.constant 0 : index
    %64 = vector.load %arg4[%c7, %c0_29, %c0_30] : memref<8x256x10xf32, #tpu.memory_space<vmem>>, vector<1x256x10xf32>
    %65 = vector.shape_cast %64 : vector<1x256x10xf32> to vector<256x10xf32>
    %cst_31 = arith.constant dense<0.000000e+00> : vector<2x10xf32>
    %66 = tpu.matmul %63, %65, %cst_31 {dimension_numbers = #tpu.dot_dimension_numbers<[1], [0], [0], [1], [0, 0, 1, 1], [], []>} : vector<2x256xf32>, vector<256x10xf32>, vector<2x10xf32> -> vector<2x10xf32>
    %67 = arith.addf %61, %66 : vector<2x10xf32>
    %c0_32 = arith.constant 0 : index
    %c0_33 = arith.constant 0 : index
    %68 = vector.load %arg7[%c0_32, %c0_33] : memref<2x10xf32, #tpu.memory_space<vmem>>, vector<2x10xf32>
    %69 = arith.addf %68, %67 : vector<2x10xf32>
    %c0_34 = arith.constant 0 : index
    %c0_35 = arith.constant 0 : index
    %70 = vector.load %arg7[%c0_34, %c0_35] : memref<2x10xf32, #tpu.memory_space<vmem>>, vector<2x10xf32>
    tpu.vector_store %arg7[%c0_34, %c0_35], %69 {strides = array<i32>} : memref<2x10xf32, #tpu.memory_space<vmem>>, vector<2x10xf32>,
    %c1_i32 = arith.constant 1 : i32
    %71 = arith.cmpi eq, %arg1, %c1_i32 : i32
    %72 = arith.extui %71 : i1 to i32
    %c0_i32_36 = arith.constant 0 : i32
    %73 = arith.cmpi ne, %72, %c0_i32_36 : i32
    scf.if %73 {
      %c0_37 = arith.constant 0 : index
      %c0_38 = arith.constant 0 : index
      %74 = vector.load %arg7[%c0_37, %c0_38] : memref<2x10xf32, #tpu.memory_space<vmem>>, vector<2x10xf32>
      %c0_39 = arith.constant 0 : index
      %c0_40 = arith.constant 0 : index
      %75 = vector.load %arg5[%c0_39, %c0_40] : memref<1x10xf32, #tpu.memory_space<vmem>>, vector<1x10xf32>
      %76 = vector.broadcast %75 : vector<1x10xf32> to vector<2x10xf32>
      %77 = arith.addf %74, %76 : vector<2x10xf32>
      %c0_41 = arith.constant 0 : index
      %c0_42 = arith.constant 0 : index
      %78 = vector.load %arg6[%c0_41, %c0_42] : memref<2x10xf32, #tpu.memory_space<vmem>>, vector<2x10xf32>
      tpu.vector_store %arg6[%c0_41, %c0_42], %77 {strides = array<i32>} : memref<2x10xf32, #tpu.memory_space<vmem>>, vector<2x10xf32>,
    } else {
    }
    return
  }
  func.func @transform_0(%arg0: i32, %arg1: i32) -> (i32, i32, i32) {
    %c0_i32 = arith.constant 0 : i32
    %c0_i32_0 = arith.constant 0 : i32
    return %arg0, %arg1, %c0_i32 : i32, i32, i32
  }
  func.func @transform_1(%arg0: i32, %arg1: i32) -> (i32, i32, i32) {
    %c0_i32 = arith.constant 0 : i32
    %c0_i32_0 = arith.constant 0 : i32
    %c0_i32_1 = arith.constant 0 : i32
    return %c0_i32, %arg1, %c0_i32_0 : i32, i32, i32
  }
  func.func @transform_2(%arg0: i32, %arg1: i32) -> (i32, i32, i32) {
    %c0_i32 = arith.constant 0 : i32
    %c0_i32_0 = arith.constant 0 : i32
    %c0_i32_1 = arith.constant 0 : i32
    return %arg1, %c0_i32, %c0_i32_0 : i32, i32, i32
  }
  func.func @transform_3(%arg0: i32, %arg1: i32) -> (i32, i32) {
    %c0_i32 = arith.constant 0 : i32
    %c0_i32_0 = arith.constant 0 : i32
    %c0_i32_1 = arith.constant 0 : i32
    return %c0_i32, %c0_i32_0 : i32, i32
  }
  func.func @transform_4(%arg0: i32, %arg1: i32) -> (i32, i32) {
    %c0_i32 = arith.constant 0 : i32
    %c0_i32_0 = arith.constant 0 : i32
    return %arg0, %c0_i32 : i32, i32
  }
}

</mosaic_0001>

<bundles_post_ra>
// kernel: tpu_custom_call.1
= control target key start
LH: loop header
LB: loop body
LE: loop exit
PB: predicated region body
PF: predicated region fallthrough
CT: control target
= control target key end

     0   :  { %9 = vsyncpa [#allocation6], 0  ;;  %s2316_s15 = smov 0   ;;  %s2318_s16 = smov 0   ;;  %s2766_s0 = inlined_call_operand.vmem [shape: f32[2,16,256], index: 0, kind: input, shape index: {}]   ;;  %s2767_s1 = inlined_call_operand.vmem [shape: f32[2,16,2], index: 1, kind: input, shape index: {}]   ;;  %s2768_s2 = inlined_call_operand.vmem [shape: f32[16,256,10], index: 2, kind: input, shape index: {}]   ;;  %s2769_s3 = inlined_call_operand.vmem [shape: f32[1,10], index: 3, kind: input, shape index: {}]   ;;  %s2770_s4 = inlined_call_operand.hbm [shape: f32[2,10], index: 4, kind: output, shape index: {}]  }
   0x1   :  { %s2320_s17 = smov 0   ;;  %s2322_s18 = smov 0  }
   0x2   :  { %s2324_s19 = smov 0  }
   0x3 LB: > { %s1380_s20 = sadd.s32 4294967295, %s2285_s19   ;;  %s24_s21 = sadd.s32 1, %s2281_s18  ;;  %s2285_s19 = sphi %s2324_s19, %s15_s19   ;;  %s2281_s18 = sphi %s2322_s18, %s2776_s18   ;;  %s2277_s17 = sphi %s2320_s17, %s2775_s17   ;;  %s2273_s16 = sphi %s2318_s16, %s2774_s16   ;;  %s2269_s15 = sphi %s2316_s15, %s2773_s15  }
   0x4   : > { %p25_p0 = scmp.ge.s32.totalorder %s24_s21, 2  ;;  %p43_p1 = scmp.ne.s32.totalorder %s2273_s16, %s2269_s15 }
   0x5   : > { %p44_p2 = scmp.eq.s32.totalorder %s2285_s19, 0  ;;  %s36_s24 = sadd.s32 1, %s2273_s16 }
   0x6   : > { %s2778_s21 = smov (%p25_p0, %s24_s21), 0  ;;  %p1382_p5 = scmp.ge.s32.totalorder %s2285_s19, 2 }
   0x7   : > { %p2348_p3 = por %p44_p2, %p43_p1  ;;  %s32_s23 = ssub.s32 %s2281_s18, %s2778_s21 }
   0x8   : > { %p34_p4 = scmp.eq.s32.totalorder %s32_s23, 0  ;;  %171 = sbr.rel (%p1382_p5) target bundleno = 29 (0x1d), region = 20 }
   0xa   : > { %s2356_s25 = scalar_select %p34_p4, %s2273_s16, %s36_s24  }
   0xf   : > { %174 = sbr.rel (!%p2348_p3) target bundleno = 22 (0x16), region = 24  ;;  %s176_s26 = sand.u32 (%p2348_p3), 1, %s2273_s16  }
  0x10   : > { %s1625_s27 = sshll.u32 (%p2348_p3), %s2281_s18, 4  ;;  %s1383_s28 = sshll.u32 (%p2348_p3), %s176_s26, 5 }
  0x11   : > { %s184_s5 = scalar_lea.vmem (%p2348_p3), %s2766_s0, %s1625_s27  ;;  %s178_s6 = scalar_lea.vmem (%p2348_p3), [#allocation3], %s1383_s28 }
  0x12   : > { %v197_v0 = vld [vmem:[%s184_s5] sm:$0xff] (%p2348_p3)  ;;  %v199_v1 = vld [vmem:[%s184_s5 + $0x8] sm:$0xff] (%p2348_p3) }
  0x13   : > { %v201_v2 = vld [vmem:[%s184_s5 + $0x20] sm:$0xff] (%p2348_p3)  ;;  %198 = vst [vmem:[%s178_s6] sm:$0xff] (%p2348_p3), %v197_v0  ;;  %200 = vst [vmem:[%s178_s6 + $0x8] sm:$0xff] (%p2348_p3), %v199_v1  ;;  %v203_v3 = vld [vmem:[%s184_s5 + $0x28] sm:$0xff] (%p2348_p3) }
  0x14   : > { %202 = vst [vmem:[%s178_s6 + $0x10] sm:$0xff] (%p2348_p3), %v201_v2  ;;  %204 = vst [vmem:[%s178_s6 + $0x18] sm:$0xff] (%p2348_p3), %v203_v3 }
  0x16 PF: > { %210 = sbr.rel (!%p2348_p3) target bundleno = 29 (0x1d), region = 47  ;;  %s212_s7 = sand.u32 (%p2348_p3), 1, %s2273_s16  }
  0x17   : > { %s1387_s8 = sshll.u32 (%p2348_p3), %s2281_s18, 3  ;;  %s1386_s9 = sshll.u32 (%p2348_p3), %s212_s7, 4 }
  0x18   : > { %s216_s12 = scalar_lea.vmem (%p2348_p3), %s2767_s1, %s1387_s8  ;;  %s214_s13 = scalar_lea.vmem (%p2348_p3), [#allocation4], %s1386_s9 }
  0x19   : > { %v246_v4 = vld [vmem:[%s216_s12] sm:$0xff] (%p2348_p3)  ;;  %v248_v5 = vld [vmem:[%s216_s12 + $0x10] sm:$0xff] (%p2348_p3) }
  0x1a   : > { %247 = vst [vmem:[%s214_s13] sm:$0xff] (%p2348_p3), %v246_v4  ;;  %249 = vst [vmem:[%s214_s13 + $0x8] sm:$0xff] (%p2348_p3), %v248_v5 }
  0x1d PF: > { %p1388_p6 = scmp.ge.s32.totalorder %s2285_s19, 1  ;;  %p264_p7 = scmp.lt.s32.totalorder %s2285_s19, 3 }
  0x1f   : > { %p265_p8 = pnand %p1388_p6, %p264_p7 }
  0x20   : > { %s271_s14 = sand.u32 (!%p265_p8), 1, %s2269_s15   ;;  %s1391_s22 = sshll.u32 (!%p265_p8), %s2277_s17, 3 }
  0x21   : > { %268 = sbr.rel (%p265_p8) target bundleno = 549 (0x225), region = 89  ;;  %s1389_s23 = sshll.u32 (!%p265_p8), %s271_s14, 5 }
  0x22   : > { %s1390_s24 = sshll.u32 (!%p265_p8), %s271_s14, 4  ;;  %p310_p9 = scmp.lt.s32.totalorder (!%p265_p8), %s1391_s22, 15 }
  0x23   : > { %s2382_s30 = scalar_lea.vmem (!%p265_p8), [#allocation3], %s1389_s23  ;;  %s280_s5 = scalar_lea.vmem (!%p265_p8), [#allocation4], %s1390_s24 }
  0x24   : > { %p1394_p10 = scmp.ne.s32.totalorder (!%p265_p8), %s2277_s17, 0 }
  0x28   : > { %s2780_s22 = smov (!%p310_p9, %s1391_s22), 15  ;;  %319 = sbr.rel (%p1394_p10) target bundleno = 47 (0x2f), region = 101 }
  0x29   : > { %s1626_s26 = sshll.u32 %s2780_s22, 8  ;;  %vm320_vm0 = vcmask (!%p1394_p10), 74752   ;;  %v2287_v6 = vmov (!%p1394_p10), 0.0  }
  0x2a   : > { %s2380_s29 = scalar_lea.vmem %s2768_s2, %s1626_s26  ;;  %321 = vst.msk [vmem:[#allocation2] sm:$0x3] (!%p1394_p10), %vm320_vm0, %v2287_v6 }
  0x2f PF: > { %v326_v7 = vld [vmem:[%s280_s5] sm:$0xff]  ;;  %v327_v8 = vld [vmem:[%s280_s5 + $0x8] sm:$0xff]  ;;  %v2288_v10 = vmov 0   ;;  %v2289_v32 = vmov 1   ;;  %vm440_vm1 = vcmask 1041409   ;;  %vm1266_vm2 = vcmask 74752  }
  0x30   : > { %v1411_v9 = vld [vmem:[%s2380_s29 + $0x180] sm:$0xff]  ;;  %2213 = vset.pattern.permute.xlu0 %v2288_v10  ;;  %2215 = vset.pattern.permute.xlu1 %v2288_v10  ;;  %v1412_v11 = vld [vmem:[%s2380_s29 + $0x188] sm:$0xff]  ;;  %v1413_v21 = vld [vmem:[%s2380_s29 + $0x190] sm:$0xff]  ;;  %p1619_p11 = scmp.ne.s32.totalorder %s2277_s17, 1 }
  0x31   : > { %v386_v12 = vld [vmem:[%s2380_s29 + $0x80] sm:$0xff]  ;;  %v387_v13 = vld [vmem:[%s2380_s29 + $0x88] sm:$0xff]  ;;  %330 = vperm.xlu0 %2213, %v326_v7   ;;  %351 = vperm.xlu1 %2215, %v327_v8   ;;  %v1907_v14 = vpack.c.bf16 %v1412_v11, %v1411_v9  ;;  %v1414_v22 = vld [vmem:[%s2380_s29 + $0x198] sm:$0xff] }
  0x32   : > { %v1939_v15 = vpack.c.bf16 %v387_v13, %v386_v12  ;;  %v1395_v16 = vld [vmem:[%s2380_s29 + $0x100] sm:$0xff]  ;;  %v1396_v17 = vld [vmem:[%s2380_s29 + $0x108] sm:$0xff]  ;;  %v1911_v24 = vpack.c.bf16 %v1414_v22, %v1413_v21  ;;  %v388_v25 = vld [vmem:[%s2380_s29 + $0x90] sm:$0xff] }
  0x33   : > { %v370_v18 = vld [vmem:[%s2380_s29] sm:$0xff]  ;;  %v1909_v19 = vpack.c.bf16 %v1396_v17, %v1395_v16  ;;  %v371_v20 = vld [vmem:[%s2380_s29 + $0x8] sm:$0xff]  ;;  %1908 = vmatprep.subr.bf16.mxu0 %v1907_v14  ;;  %v389_v26 = vld [vmem:[%s2380_s29 + $0x98] sm:$0xff] }
  0x34   : > { %1940 = vmatprep.subr.bf16.mxu1 %v1939_v15  ;;  %v1941_v23 = vpack.c.bf16 %v371_v20, %v370_v18  ;;  %v1397_v27 = vld [vmem:[%s2380_s29 + $0x110] sm:$0xff]  ;;  %v1943_v28 = vpack.c.bf16 %v389_v26, %v388_v25  ;;  %v1398_v29 = vld [vmem:[%s2380_s29 + $0x118] sm:$0xff]  ;;  %v1415_v34 = vld [vmem:[%s2380_s29 + $0x1a0] sm:$0xff] }
  0x35   : > { %1910 = vmatpush3.bf16.msra.mxu0 %v1909_v19  ;;  %v372_v30 = vld [vmem:[%s2380_s29 + $0x10] sm:$0xff]  ;;  %v373_v31 = vld [vmem:[%s2380_s29 + $0x18] sm:$0xff]  ;;  %2214 = vset.pattern.permute.xlu0 %v2289_v32  ;;  %v1913_v33 = vpack.c.bf16 %v1398_v29, %v1397_v27  ;;  %v1416_v35 = vld [vmem:[%s2380_s29 + $0x1a8] sm:$0xff] }
  0x36   : > { %2216 = vset.pattern.permute.xlu1 %v2289_v32  ;;  %v390_v36 = vld [vmem:[%s2380_s29 + $0xa0] sm:$0xff]  ;;  %338 = vperm.xlu0 %2214, %v326_v7   ;;  %v1915_v37 = vpack.c.bf16 %v1416_v35, %v1415_v34  ;;  %v391_v38 = vld [vmem:[%s2380_s29 + $0xa8] sm:$0xff]  ;;  %v1945_v41 = vpack.c.bf16 %v373_v31, %v372_v30  ;;  %v1417_v43 = vld [vmem:[%s2380_s29 + $0x1b0] sm:$0xff] }
  0x37   : > { %359 = vperm.xlu1 %2216, %v327_v8   ;;  %v1399_v39 = vld [vmem:[%s2380_s29 + $0x120] sm:$0xff]  ;;  %v1400_v40 = vld [vmem:[%s2380_s29 + $0x128] sm:$0xff]  ;;  %1942 = vmatpush3.bf16.msra.mxu1 %v1941_v23  ;;  %v1947_v44 = vpack.c.bf16 %v391_v38, %v390_v36  ;;  %v1418_v47 = vld [vmem:[%s2380_s29 + $0x1b8] sm:$0xff] }
  0x38   : > { %1912 = vmatprep.subr.bf16.mxu0 %v1911_v24  ;;  %v374_v42 = vld [vmem:[%s2380_s29 + $0x20] sm:$0xff]  ;;  %1944 = vmatprep.subr.bf16.mxu1 %v1943_v28  ;;  %v1917_v45 = vpack.c.bf16 %v1400_v40, %v1399_v39  ;;  %v375_v46 = vld [vmem:[%s2380_s29 + $0x28] sm:$0xff]  ;;  %v392_v48 = vld [vmem:[%s2380_s29 + $0xb0] sm:$0xff]  ;;  %v1919_v49 = vpack.c.bf16 %v1418_v47, %v1417_v43 }
  0x39   : > { %1914 = vmatpush3.bf16.msra.mxu0 %v1913_v33  ;;  %v393_v50 = vld [vmem:[%s2380_s29 + $0xb8] sm:$0xff]  ;;  %v1401_v51 = vld [vmem:[%s2380_s29 + $0x130] sm:$0xff]  ;;  %v1419_v53 = vld [vmem:[%s2380_s29 + $0x1c0] sm:$0xff]  ;;  %v1949_v55 = vpack.c.bf16 %v375_v46, %v374_v42 }
  0x3a   : > { %1916 = vmatprep.subr.bf16.mxu0 %v1915_v37  ;;  %v1402_v52 = vld [vmem:[%s2380_s29 + $0x138] sm:$0xff]  ;;  %v1420_v54 = vld [vmem:[%s2380_s29 + $0x1c8] sm:$0xff]  ;;  %v1951_v56 = vpack.c.bf16 %v393_v50, %v392_v48  ;;  %v376_v58 = vld [vmem:[%s2380_s29 + $0x30] sm:$0xff] }
  0x3b   : > { %1946 = vmatpush3.bf16.msra.mxu1 %v1945_v41  ;;  %v1921_v57 = vpack.c.bf16 %v1402_v52, %v1401_v51  ;;  %v377_v59 = vld [vmem:[%s2380_s29 + $0x38] sm:$0xff]  ;;  %v394_v60 = vld [vmem:[%s2380_s29 + $0xc0] sm:$0xff]  ;;  %v1923_v61 = vpack.c.bf16 %v1420_v54, %v1419_v53  ;;  %v395_v62 = vld [vmem:[%s2380_s29 + $0xc8] sm:$0xff] }
  0x3c   : > { %1948 = vmatprep.subr.bf16.mxu1 %v1947_v44  ;;  %v1403_v63 = vld [vmem:[%s2380_s29 + $0x140] sm:$0xff]  ;;  %v1404_v0 = vld [vmem:[%s2380_s29 + $0x148] sm:$0xff]  ;;  %v1421_v1 = vld [vmem:[%s2380_s29 + $0x1d0] sm:$0xff]  ;;  %v1953_v3 = vpack.c.bf16 %v377_v59, %v376_v58  ;;  %v1955_v4 = vpack.c.bf16 %v395_v62, %v394_v60 }
  0x3d   : > { %1918 = vmatpush3.bf16.msra.mxu0 %v1917_v45  ;;  %v1422_v2 = vld [vmem:[%s2380_s29 + $0x1d8] sm:$0xff]  ;;  %v1925_v5 = vpack.c.bf16 %v1404_v0, %v1403_v63  ;;  %v378_v6 = vld [vmem:[%s2380_s29 + $0x40] sm:$0xff]  ;;  %v379_v7 = vld [vmem:[%s2380_s29 + $0x48] sm:$0xff] }
  0x3e   : > { %1920 = vmatprep.subr.bf16.mxu0 %v1919_v49  ;;  %v396_v8 = vld [vmem:[%s2380_s29 + $0xd0] sm:$0xff]  ;;  %v1927_v9 = vpack.c.bf16 %v1422_v2, %v1421_v1  ;;  %v397_v10 = vld [vmem:[%s2380_s29 + $0xd8] sm:$0xff]  ;;  %v1423_v13 = vld [vmem:[%s2380_s29 + $0x1e0] sm:$0xff]  ;;  %v1957_v15 = vpack.c.bf16 %v379_v7, %v378_v6 }
  0x3f   : > { %1950 = vmatpush3.bf16.msra.mxu1 %v1949_v55  ;;  %v1405_v11 = vld [vmem:[%s2380_s29 + $0x150] sm:$0xff]  ;;  %v1406_v12 = vld [vmem:[%s2380_s29 + $0x158] sm:$0xff]  ;;  %v1424_v14 = vld [vmem:[%s2380_s29 + $0x1e8] sm:$0xff]  ;;  %v1959_v16 = vpack.c.bf16 %v397_v10, %v396_v8 }
  0x40   : > { %1952 = vmatprep.subr.bf16.mxu1 %v1951_v56  ;;  %v1929_v17 = vpack.c.bf16 %v1406_v12, %v1405_v11  ;;  %v380_v18 = vld [vmem:[%s2380_s29 + $0x50] sm:$0xff]  ;;  %v381_v19 = vld [vmem:[%s2380_s29 + $0x58] sm:$0xff]  ;;  %v398_v20 = vld [vmem:[%s2380_s29 + $0xe0] sm:$0xff]  ;;  %v1931_v21 = vpack.c.bf16 %v1424_v14, %v1423_v13 }
  0x41   : > { %1922 = vmatpush3.bf16.msra.mxu0 %v1921_v57  ;;  %v399_v22 = vld [vmem:[%s2380_s29 + $0xe8] sm:$0xff]  ;;  %v1407_v23 = vld [vmem:[%s2380_s29 + $0x160] sm:$0xff]  ;;  %v1425_v25 = vld [vmem:[%s2380_s29 + $0x1f0] sm:$0xff]  ;;  %v1961_v27 = vpack.c.bf16 %v381_v19, %v380_v18 }
  0x42   : > { %1924 = vmatprep.subr.bf16.mxu0 %v1923_v61  ;;  %v1408_v24 = vld [vmem:[%s2380_s29 + $0x168] sm:$0xff]  ;;  %v1426_v26 = vld [vmem:[%s2380_s29 + $0x1f8] sm:$0xff]  ;;  %v1963_v28 = vpack.c.bf16 %v399_v22, %v398_v20  ;;  %v382_v30 = vld [vmem:[%s2380_s29 + $0x60] sm:$0xff] }
  0x43   : > { %1954 = vmatpush3.bf16.msra.mxu1 %v1953_v3  ;;  %v1933_v29 = vpack.c.bf16 %v1408_v24, %v1407_v23  ;;  %v383_v31 = vld [vmem:[%s2380_s29 + $0x68] sm:$0xff]  ;;  %v400_v32 = vld [vmem:[%s2380_s29 + $0xf0] sm:$0xff]  ;;  %v1935_v33 = vpack.c.bf16 %v1426_v26, %v1425_v25  ;;  %v401_v34 = vld [vmem:[%s2380_s29 + $0xf8] sm:$0xff] }
  0x44   : > { %1956 = vmatprep.subr.bf16.mxu1 %v1955_v4  ;;  %v1409_v35 = vld [vmem:[%s2380_s29 + $0x170] sm:$0xff]  ;;  %v1410_v36 = vld [vmem:[%s2380_s29 + $0x178] sm:$0xff]  ;;  %v1443_v37 = vld [vmem:[%s2380_s29 + $0x280] sm:$0xff]  ;;  %v1965_v39 = vpack.c.bf16 %v383_v31, %v382_v30  ;;  %v1967_v40 = vpack.c.bf16 %v401_v34, %v400_v32 }
  0x45   : > { %1926 = vmatpush3.bf16.msra.mxu0 %v1925_v5  ;;  %v1444_v38 = vld [vmem:[%s2380_s29 + $0x288] sm:$0xff]  ;;  %v1937_v41 = vpack.c.bf16 %v1410_v36, %v1409_v35  ;;  %v384_v42 = vld [vmem:[%s2380_s29 + $0x70] sm:$0xff]  ;;  %v385_v43 = vld [vmem:[%s2380_s29 + $0x78] sm:$0xff] }
  0x46   : > { %1928 = vmatprep.subr.bf16.mxu0 %v1927_v9  ;;  %v1971_v44 = vpack.c.bf16 %v1444_v38, %v1443_v37  ;;  %v1475_v45 = vld [vmem:[%s2380_s29 + $0x380] sm:$0xff]  ;;  %v1476_v46 = vld [vmem:[%s2380_s29 + $0x388] sm:$0xff]  ;;  %v1969_v47 = vpack.c.bf16 %v385_v43, %v384_v42  ;;  %v324_v52 = vld [vmem:[%s2382_s30 + $0x10] sm:$0xff] }
  0x47   : > { %1958 = vmatpush3.bf16.msra.mxu1 %v1957_v15  ;;  %v2003_v48 = vpack.c.bf16 %v1476_v46, %v1475_v45  ;;  %v322_v50 = vld [vmem:[%s2382_s30] sm:$0xff]  ;;  %v323_v51 = vld [vmem:[%s2382_s30 + $0x8] sm:$0xff]  ;;  %v325_v53 = vld [vmem:[%s2382_s30 + $0x18] sm:$0xff] }
  0x48   : > { %1960 = vmatprep.subr.bf16.mxu1 %v1959_v16  ;;  %v1427_v9 = vld [vmem:[%s2380_s29 + $0x200] sm:$0xff]  ;;  %v1428_v14 = vld [vmem:[%s2380_s29 + $0x208] sm:$0xff]  ;;  %v1446_v24 = vld [vmem:[%s2380_s29 + $0x298] sm:$0xff] }
  0x49   : > { %1930 = vmatpush3.bf16.msra.mxu0 %v1929_v17  ;;  %v1459_v15 = vld [vmem:[%s2380_s29 + $0x300] sm:$0xff]  ;;  %v1460_v16 = vld [vmem:[%s2380_s29 + $0x308] sm:$0xff]  ;;  %v1973_v22 = vpack.c.bf16 %v1428_v14, %v1427_v9  ;;  %v1477_v25 = vld [vmem:[%s2380_s29 + $0x390] sm:$0xff] }
  0x4a   : > { %1932 = vmatprep.subr.bf16.mxu0 %v1931_v21  ;;  %v1445_v21 = vld [vmem:[%s2380_s29 + $0x290] sm:$0xff]  ;;  %v2005_v23 = vpack.c.bf16 %v1460_v16, %v1459_v15  ;;  %v1478_v26 = vld [vmem:[%s2380_s29 + $0x398] sm:$0xff]  ;;  %v1447_v43 = vld [vmem:[%s2380_s29 + $0x2a0] sm:$0xff] }
  0x4b   : > { %1962 = vmatpush3.bf16.msra.mxu1 %v1961_v27  ;;  %v1429_v31 = vld [vmem:[%s2380_s29 + $0x210] sm:$0xff]  ;;  %v1430_v32 = vld [vmem:[%s2380_s29 + $0x218] sm:$0xff]  ;;  %v1479_v45 = vld [vmem:[%s2380_s29 + $0x3a0] sm:$0xff]  ;;  %v1975_v46 = vpack.c.bf16 %v1446_v24, %v1445_v21 }
  0x4c   : > { %1964 = vmatprep.subr.bf16.mxu1 %v1963_v28  ;;  %v1461_v37 = vld [vmem:[%s2380_s29 + $0x310] sm:$0xff]  ;;  %v1462_v38 = vld [vmem:[%s2380_s29 + $0x318] sm:$0xff] }
  0x4d   : > { %1934 = vmatpush3.bf16.msra.mxu0 %v1933_v29  ;;  %v1466_v24 = vld [vmem:[%s2380_s29 + $0x338] sm:$0xff] }
  0x4e   : > { %1936 = vmatprep.subr.bf16.mxu0 %v1935_v33 }
  0x4f   : > { %1966 = vmatpush3.bf16.msra.mxu1 %v1965_v39 }
  0x50   : > { %1968 = vmatprep.subr.bf16.mxu1 %v1967_v40 }
  0x51   : > { %1938 = vmatpush3.bf16.msra.mxu0 %v1937_v41 }
  0x52   : > { %1972 = vmatprep.subr.bf16.mxu0 %v1971_v44  ;;  %v1448_v44 = vld [vmem:[%s2380_s29 + $0x2a8] sm:$0xff] }
  0x53   : > { %1970 = vmatpush3.bf16.msra.mxu1 %v1969_v47  ;;  %v2007_v47 = vpack.c.bf16 %v1478_v26, %v1477_v25  ;;  %v1451_v25 = vld [vmem:[%s2380_s29 + $0x2c0] sm:$0xff] }
  0x54   : > { %2004 = vmatprep.subr.bf16.mxu1 %v2003_v48  ;;  %v1480_v48 = vld [vmem:[%s2380_s29 + $0x3a8] sm:$0xff] }
  0xb0   : > { %v331_v49 = vpop.permute.xlu0 %330  ;;  %v352_v54 = vpop.permute.xlu1 %351 }
  0xb1   : > { %v333_v55 = vmul.f32 %v331_v49, %v322_v50  ;;  %v334_v56 = vmul.f32 %v331_v49, %v323_v51  ;;  %v335_v57 = vmul.f32 %v331_v49, %v324_v52  ;;  %v336_v58 = vmul.f32 %v331_v49, %v325_v53  ;;  %v1431_v49 = vld [vmem:[%s2380_s29 + $0x220] sm:$0xff]  ;;  %v1432_v50 = vld [vmem:[%s2380_s29 + $0x228] sm:$0xff] }
  0xb2   : > { %v1977_v51 = vpack.c.bf16 %v1430_v32, %v1429_v31  ;;  %v2009_v52 = vpack.c.bf16 %v1462_v38, %v1461_v37  ;;  %v1463_v53 = vld [vmem:[%s2380_s29 + $0x320] sm:$0xff] }
  0xb5   : > { %v339_v59 = vpop.permute.xlu0 %338 }
  0xb6   : > { %v341_v60 = vadd.f32 %v339_v59, %v333_v55  ;;  %v342_v61 = vadd.f32 %v339_v59, %v334_v56  ;;  %v343_v62 = vadd.f32 %v339_v59, %v335_v57  ;;  %v344_v63 = vadd.f32 %v339_v59, %v336_v58  ;;  %v360_v4 = vpop.permute.xlu1 %359 }
  0xb7   : > { %v1979_v57 = vpack.c.bf16 %v1448_v44, %v1447_v43  ;;  %v2011_v59 = vpack.c.bf16 %v1480_v48, %v1479_v45  ;;  %v1485_v43 = vld [vmem:[%s2380_s29 + $0x3d0] sm:$0xff]  ;;  %v1486_v44 = vld [vmem:[%s2380_s29 + $0x3d8] sm:$0xff] }
  0xb8   : > { %v345_v0 = vmax.f32 %v341_v60, 0.0  ;;  %v346_v1 = vmax.f32 %v342_v61, 0.0  ;;  %v347_v2 = vmax.f32 %v343_v62, 0.0  ;;  %v348_v3 = vmax.f32 %v344_v63, 0.0  ;;  %v1449_v61 = vld [vmem:[%s2380_s29 + $0x2b0] sm:$0xff]  ;;  %v1438_v48 = vld [vmem:[%s2380_s29 + $0x258] sm:$0xff] }
  0xb9   : > { %v1981_v60 = vpack.c.bf16 %v1432_v50, %v1431_v49  ;;  %v2023_v50 = vpack.c.bf16 %v1486_v44, %v1485_v43  ;;  %v1541_v43 = vld [vmem:[%s2380_s29 + $0x590] sm:$0xff]  ;;  %v1542_v44 = vld [vmem:[%s2380_s29 + $0x598] sm:$0xff] }
  0xba   : > { %v354_v5 = vmul.f32 %v352_v54, %v345_v0  ;;  %v355_v6 = vmul.f32 %v352_v54, %v346_v1  ;;  %v356_v7 = vmul.f32 %v352_v54, %v347_v2  ;;  %v357_v8 = vmul.f32 %v352_v54, %v348_v3  ;;  %v1464_v54 = vld [vmem:[%s2380_s29 + $0x328] sm:$0xff]  ;;  %v1450_v1 = vld [vmem:[%s2380_s29 + $0x2b8] sm:$0xff]  ;;  %v1481_v2 = vld [vmem:[%s2380_s29 + $0x3b0] sm:$0xff] }
  0xbb   : > { %v2013_v0 = vpack.c.bf16 %v1464_v54, %v1463_v53  ;;  %v1482_v3 = vld [vmem:[%s2380_s29 + $0x3b8] sm:$0xff]  ;;  %v1983_v21 = vpack.c.bf16 %v1450_v1, %v1449_v61  ;;  %v1455_v53 = vld [vmem:[%s2380_s29 + $0x2e0] sm:$0xff]  ;;  %v1456_v54 = vld [vmem:[%s2380_s29 + $0x2e8] sm:$0xff] }
  0xbc   : > { %v362_v10 = vadd.f32 %v360_v4, %v354_v5  ;;  %v363_v11 = vadd.f32 %v360_v4, %v355_v6  ;;  %v364_v12 = vadd.f32 %v360_v4, %v356_v7  ;;  %v365_v13 = vadd.f32 %v360_v4, %v357_v8  ;;  %v1457_v1 = vld [vmem:[%s2380_s29 + $0x2f0] sm:$0xff] }
  0xbd   : > { %v1995_v61 = vpack.c.bf16 %v1456_v54, %v1455_v53  ;;  %v2071_v53 = vpack.c.bf16 %v1542_v44, %v1541_v43  ;;  %v1526_v54 = vld [vmem:[%s2380_s29 + $0x518] sm:$0xff]  ;;  %v1501_v44 = vld [vmem:[%s2380_s29 + $0x450] sm:$0xff] }
  0xbe   : > { %v2461_v17 = vmax.f32 %v362_v10, 0.0  ;;  %v2463_v18 = vmax.f32 %v363_v11, 0.0  ;;  %v2465_v19 = vmax.f32 %v364_v12, 0.0  ;;  %v2467_v20 = vmax.f32 %v365_v13, 0.0  ;;  %v1433_v11 = vld [vmem:[%s2380_s29 + $0x230] sm:$0xff]  ;;  %v1434_v12 = vld [vmem:[%s2380_s29 + $0x238] sm:$0xff] }
  0xc0   : > { %v442_v27 = vrot.slane %v2463_v18, 1  ;;  %v518_v28 = vrot.slane %v2467_v20, 7  ;;  %v439_v29 = vrot.slane %v2461_v17, 1  ;;  %v516_v30 = vrot.slane %v2465_v19, 7 }
  0xc1   : > { %v628_v33 = vrot.slane %v2463_v18, 2  ;;  %v629_v34 = vrot.slane %v2467_v20, 1  ;;  %v740_v35 = vrot.slane %v2463_v18, 3  ;;  %v741_v36 = vrot.slane %v2467_v20, 2 }
  0xc2   : > { %v443_v39 = vsel %vm440_vm1, %v2467_v20, %v442_v27  ;;  %v519_v40 = vsel %vm440_vm1, %v518_v28, %v2463_v18  ;;  %v441_v41 = vsel %vm440_vm1, %v2465_v19, %v439_v29  ;;  %v517_v42 = vsel %vm440_vm1, %v516_v30, %v2461_v17  ;;  %v1452_v28 = vld [vmem:[%s2380_s29 + $0x2c8] sm:$0xff]  ;;  %v1483_v29 = vld [vmem:[%s2380_s29 + $0x3c0] sm:$0xff] }
  0xc3   : > { %510 = vmatprep.mubr.f32.mxu0 %v443_v39  ;;  %586 = vmatprep.mubr.f32.mxu1 %v519_v40  ;;  %v630_v55 = vsel %vm440_vm1, %v629_v34, %v628_v33  ;;  %v742_v56 = vsel %vm440_vm1, %v741_v36, %v740_v35  ;;  %v849_v58 = vrot.slane %v2461_v17, 4  ;;  %v850_v62 = vrot.slane %v2465_v19, 3  ;;  %v1484_v30 = vld [vmem:[%s2380_s29 + $0x3c8] sm:$0xff]  ;;  %v1435_v35 = vld [vmem:[%s2380_s29 + $0x240] sm:$0xff] }
  0xc4   : > { %511 = vmatmul.mubr.f32.vlgmr.msra.gmra.mrb[0].mxu0 %v441_v41  ;;  %587 = vmatmul.mubr.f32.vlgmr.msra.gmra.mrb[0].mxu1 %v517_v42  ;;  %v961_v63 = vrot.slane %v2461_v17, 5  ;;  %v962_v4 = vrot.slane %v2465_v19, 4  ;;  %v1076_v5 = vrot.slane %v2463_v18, 6  ;;  %v1077_v6 = vrot.slane %v2467_v20, 5  ;;  %v1436_v36 = vld [vmem:[%s2380_s29 + $0x248] sm:$0xff]  ;;  %v1467_v39 = vld [vmem:[%s2380_s29 + $0x340] sm:$0xff] }
  0xc5   : > { %1974 = vmatpush3.bf16.msra.mxu0 %v1973_v22  ;;  %2006 = vmatpush3.bf16.msra.mxu1 %v2005_v23  ;;  %v2514_v7 = vsel %vm440_vm1, %v850_v62, %v849_v58  ;;  %v1188_v8 = vrot.slane %v2463_v18, 7  ;;  %v1189_v9 = vrot.slane %v2467_v20, 6  ;;  %v1073_v10 = vrot.slane %v2461_v17, 6  ;;  %v1465_v23 = vld [vmem:[%s2380_s29 + $0x330] sm:$0xff]  ;;  %v1468_v40 = vld [vmem:[%s2380_s29 + $0x348] sm:$0xff]  ;;  %v1454_v42 = vld [vmem:[%s2380_s29 + $0x2d8] sm:$0xff] }
  0xc6   : > { %697 = vmatprep.mubr.f32.mxu0 %v630_v55  ;;  %809 = vmatprep.mubr.f32.mxu1 %v742_v56  ;;  %v2522_v13 = vsel %vm440_vm1, %v962_v4, %v961_v63  ;;  %v2525_v14 = vsel %vm440_vm1, %v1077_v6, %v1076_v5  ;;  %v1074_v15 = vrot.slane %v2465_v19, 5  ;;  %v1185_v16 = vrot.slane %v2461_v17, 7  ;;  %v1453_v41 = vld [vmem:[%s2380_s29 + $0x2d0] sm:$0xff]  ;;  %v1487_v55 = vld [vmem:[%s2380_s29 + $0x3e0] sm:$0xff]  ;;  %v1488_v56 = vld [vmem:[%s2380_s29 + $0x3e8] sm:$0xff] }
  0xc7   : > { %1976 = vmatprep.subr.bf16.mxu0 %v1975_v46  ;;  %2008 = vmatprep.subr.bf16.mxu1 %v2007_v47  ;;  %v2015_v22 = vpack.c.bf16 %v1482_v3, %v1481_v2  ;;  %v2533_v26 = vsel %vm440_vm1, %v1189_v9, %v1188_v8  ;;  %v1186_v27 = vrot.slane %v2465_v19, 6  ;;  %v1985_v33 = vpack.c.bf16 %v1434_v12, %v1433_v11  ;;  %v1437_v47 = vld [vmem:[%s2380_s29 + $0x250] sm:$0xff]  ;;  %v1471_v63 = vld [vmem:[%s2380_s29 + $0x360] sm:$0xff]  ;;  %v1458_v2 = vld [vmem:[%s2380_s29 + $0x2f8] sm:$0xff] }
  0xc8   : > { %v2540_v31 = vsel %vm440_vm1, %v1074_v15, %v1073_v10  ;;  %v2017_v34 = vpack.c.bf16 %v1466_v24, %v1465_v23  ;;  %v1987_v37 = vpack.c.bf16 %v1452_v28, %v1451_v25  ;;  %v2019_v38 = vpack.c.bf16 %v1484_v30, %v1483_v29  ;;  %v1489_v3 = vld [vmem:[%s2380_s29 + $0x3f0] sm:$0xff]  ;;  %v1490_v4 = vld [vmem:[%s2380_s29 + $0x3f8] sm:$0xff]  ;;  %v1540_v23 = vld [vmem:[%s2380_s29 + $0x588] sm:$0xff] }
  0xc9   : > { %1978 = vmatpush3.bf16.msra.mxu0 %v1977_v51  ;;  %2010 = vmatpush3.bf16.msra.mxu1 %v2009_v52  ;;  %v2543_v32 = vsel %vm440_vm1, %v1186_v27, %v1185_v16  ;;  %v1989_v45 = vpack.c.bf16 %v1436_v36, %v1435_v35  ;;  %v2021_v46 = vpack.c.bf16 %v1468_v40, %v1467_v39  ;;  %v1469_v51 = vld [vmem:[%s2380_s29 + $0x350] sm:$0xff]  ;;  %v1470_v52 = vld [vmem:[%s2380_s29 + $0x358] sm:$0xff]  ;;  %v1507_v16 = vld [vmem:[%s2380_s29 + $0x480] sm:$0xff]  ;;  %v626_v35 = vrot.slane %v2465_v19, 1 }
  0xca   : > { %1980 = vmatprep.subr.bf16.mxu0 %v1979_v57  ;;  %2012 = vmatprep.subr.bf16.mxu1 %v2011_v59  ;;  %v1991_v49 = vpack.c.bf16 %v1454_v42, %v1453_v41  ;;  %v1993_v57 = vpack.c.bf16 %v1438_v48, %v1437_v47  ;;  %v2025_v58 = vpack.c.bf16 %v1470_v52, %v1469_v51  ;;  %v1439_v59 = vld [vmem:[%s2380_s29 + $0x260] sm:$0xff]  ;;  %v1441_v8 = vld [vmem:[%s2380_s29 + $0x270] sm:$0xff]  ;;  %v1442_v9 = vld [vmem:[%s2380_s29 + $0x278] sm:$0xff]  ;;  %v737_v36 = vrot.slane %v2461_v17, 3 }
  0xcb   : > { %v2027_v62 = vpack.c.bf16 %v1488_v56, %v1487_v55  ;;  %v1999_v10 = vpack.c.bf16 %v1458_v2, %v1457_v1  ;;  %v2031_v11 = vpack.c.bf16 %v1490_v4, %v1489_v3  ;;  %v1473_v12 = vld [vmem:[%s2380_s29 + $0x370] sm:$0xff]  ;;  %v1474_v15 = vld [vmem:[%s2380_s29 + $0x378] sm:$0xff]  ;;  %v2001_v24 = vpack.c.bf16 %v1442_v9, %v1441_v8  ;;  %v1491_v29 = vld [vmem:[%s2380_s29 + $0x400] sm:$0xff] }
  0xcc   : > { %v2033_v25 = vpack.c.bf16 %v1474_v15, %v1473_v12  ;;  %v1492_v30 = vld [vmem:[%s2380_s29 + $0x408] sm:$0xff]  ;;  %v1509_v39 = vld [vmem:[%s2380_s29 + $0x490] sm:$0xff]  ;;  %v852_v40 = vrot.slane %v2463_v18, 4  ;;  %v853_v41 = vrot.slane %v2467_v20, 3  ;;  %v1510_v42 = vld [vmem:[%s2380_s29 + $0x498] sm:$0xff] }
  0xcd   : > { %1982 = vmatpush3.bf16.msra.mxu0 %v1981_v60  ;;  %2014 = vmatpush3.bf16.msra.mxu1 %v2013_v0  ;;  %v1440_v60 = vld [vmem:[%s2380_s29 + $0x268] sm:$0xff]  ;;  %v1493_v47 = vld [vmem:[%s2380_s29 + $0x410] sm:$0xff]  ;;  %v1494_v48 = vld [vmem:[%s2380_s29 + $0x418] sm:$0xff]  ;;  %v2039_v52 = vpack.c.bf16 %v1510_v42, %v1509_v39 }
  0xce   : > { %1984 = vmatprep.subr.bf16.mxu0 %v1983_v21  ;;  %2016 = vmatprep.subr.bf16.mxu1 %v2015_v22  ;;  %v1472_v0 = vld [vmem:[%s2380_s29 + $0x368] sm:$0xff]  ;;  %v1997_v5 = vpack.c.bf16 %v1440_v60, %v1439_v59  ;;  %v1539_v22 = vld [vmem:[%s2380_s29 + $0x580] sm:$0xff]  ;;  %v2041_v59 = vpack.c.bf16 %v1494_v48, %v1493_v47  ;;  %v1513_v3 = vld [vmem:[%s2380_s29 + $0x4b0] sm:$0xff] }
  0xcf   : > { %v2029_v6 = vpack.c.bf16 %v1472_v0, %v1471_v63  ;;  %v1508_v21 = vld [vmem:[%s2380_s29 + $0x488] sm:$0xff]  ;;  %v2067_v28 = vpack.c.bf16 %v1540_v23, %v1539_v22  ;;  %v1511_v55 = vld [vmem:[%s2380_s29 + $0x4a0] sm:$0xff]  ;;  %v1514_v4 = vld [vmem:[%s2380_s29 + $0x4b8] sm:$0xff] }
  0xd0   : > { %v2035_v27 = vpack.c.bf16 %v1508_v21, %v1507_v16  ;;  %v1543_v56 = vld [vmem:[%s2380_s29 + $0x5a0] sm:$0xff]  ;;  %v1496_v63 = vld [vmem:[%s2380_s29 + $0x428] sm:$0xff]  ;;  %v1498_v12 = vld [vmem:[%s2380_s29 + $0x438] sm:$0xff] }
  0xd1   : > { %1986 = vmatpush3.bf16.msra.mxu0 %v1985_v33  ;;  %2018 = vmatpush3.bf16.msra.mxu1 %v2017_v34  ;;  %v1523_v33 = vld [vmem:[%s2380_s29 + $0x500] sm:$0xff]  ;;  %v625_v34 = vrot.slane %v2461_v17, 2  ;;  %v2037_v17 = vpack.c.bf16 %v1492_v30, %v1491_v29  ;;  %v1528_v2 = vld [vmem:[%s2380_s29 + $0x528] sm:$0xff]  ;;  %v1529_v15 = vld [vmem:[%s2380_s29 + $0x530] sm:$0xff] }
  0xd2   : > { %1988 = vmatprep.subr.bf16.mxu0 %v1987_v37  ;;  %2020 = vmatprep.subr.bf16.mxu1 %v2019_v38  ;;  %v738_v37 = vrot.slane %v2465_v19, 2  ;;  %v1524_v38 = vld [vmem:[%s2380_s29 + $0x508] sm:$0xff]  ;;  %v964_v19 = vrot.slane %v2463_v18, 5  ;;  %v1527_v0 = vld [vmem:[%s2380_s29 + $0x520] sm:$0xff]  ;;  %v1530_v21 = vld [vmem:[%s2380_s29 + $0x538] sm:$0xff] }
  0xd3   : > { %v1512_v18 = vld [vmem:[%s2380_s29 + $0x4a8] sm:$0xff]  ;;  %v2077_v9 = vpack.c.bf16 %v1528_v2, %v1527_v0  ;;  %v1515_v22 = vld [vmem:[%s2380_s29 + $0x4c0] sm:$0xff]  ;;  %v1549_v39 = vld [vmem:[%s2380_s29 + $0x5d0] sm:$0xff] }
  0xd4   : > { %v739_v51 = vsel %vm440_vm1, %v738_v37, %v737_v36  ;;  %v1516_v23 = vld [vmem:[%s2380_s29 + $0x4c8] sm:$0xff]  ;;  %v1499_v30 = vld [vmem:[%s2380_s29 + $0x440] sm:$0xff]  ;;  %v1517_v37 = vld [vmem:[%s2380_s29 + $0x4d0] sm:$0xff] }
  0xd5   : > { %1990 = vmatpush3.bf16.msra.mxu0 %v1989_v45  ;;  %2022 = vmatpush3.bf16.msra.mxu1 %v2021_v46  ;;  %v965_v45 = vrot.slane %v2467_v20, 4  ;;  %v2069_v46 = vpack.c.bf16 %v1524_v38, %v1523_v33  ;;  %v854_v20 = vsel %vm440_vm1, %v853_v41, %v852_v40  ;;  %v2051_v29 = vpack.c.bf16 %v1516_v23, %v1515_v22  ;;  %v1500_v33 = vld [vmem:[%s2380_s29 + $0x448] sm:$0xff]  ;;  %v1518_v38 = vld [vmem:[%s2380_s29 + $0x4d8] sm:$0xff]  ;;  %v1519_v47 = vld [vmem:[%s2380_s29 + $0x4e0] sm:$0xff] }
  0xd6   : > { %1992 = vmatprep.subr.bf16.mxu0 %v1991_v49  ;;  %2024 = vmatprep.subr.bf16.mxu1 %v2023_v50  ;;  %v1525_v49 = vld [vmem:[%s2380_s29 + $0x510] sm:$0xff]  ;;  %v627_v50 = vsel %vm440_vm1, %v626_v35, %v625_v34  ;;  %v1531_v34 = vld [vmem:[%s2380_s29 + $0x540] sm:$0xff]  ;;  %v1532_v36 = vld [vmem:[%s2380_s29 + $0x548] sm:$0xff]  ;;  %v2053_v41 = vpack.c.bf16 %v1500_v33, %v1499_v30  ;;  %v2055_v43 = vpack.c.bf16 %v1518_v38, %v1517_v37 }
  0xd7   : > { %v2073_v60 = vpack.c.bf16 %v1526_v54, %v1525_v49  ;;  %v1550_v40 = vld [vmem:[%s2380_s29 + $0x5d8] sm:$0xff]  ;;  %v2085_v42 = vpack.c.bf16 %v1532_v36, %v1531_v34  ;;  %v1520_v48 = vld [vmem:[%s2380_s29 + $0x4e8] sm:$0xff]  ;;  %v1551_v49 = vld [vmem:[%s2380_s29 + $0x5e0] sm:$0xff] }
  0xd8   : > { %v1503_v54 = vld [vmem:[%s2380_s29 + $0x460] sm:$0xff]  ;;  %v1505_v0 = vld [vmem:[%s2380_s29 + $0x470] sm:$0xff]  ;;  %v1588_v23 = vld [vmem:[%s2380_s29 + $0x708] sm:$0xff] }
  0xd9   : > { %1994 = vmatpush3.bf16.msra.mxu0 %v1993_v57  ;;  %2026 = vmatpush3.bf16.msra.mxu1 %v2025_v58  ;;  %v1544_v57 = vld [vmem:[%s2380_s29 + $0x5a8] sm:$0xff]  ;;  %v966_v58 = vsel %vm440_vm1, %v965_v45, %v964_v19  ;;  %v1533_v19 = vld [vmem:[%s2380_s29 + $0x550] sm:$0xff]  ;;  %v2087_v45 = vpack.c.bf16 %v1550_v40, %v1549_v39  ;;  %v1587_v22 = vld [vmem:[%s2380_s29 + $0x700] sm:$0xff] }
  0xda   : > { %1996 = vmatprep.subr.bf16.mxu0 %v1995_v61  ;;  %2028 = vmatprep.subr.bf16.mxu1 %v2027_v62  ;;  %v2043_v61 = vpack.c.bf16 %v1512_v18, %v1511_v55  ;;  %v1495_v62 = vld [vmem:[%s2380_s29 + $0x420] sm:$0xff]  ;;  %v2075_v1 = vpack.c.bf16 %v1544_v57, %v1543_v56  ;;  %v1504_v55 = vld [vmem:[%s2380_s29 + $0x468] sm:$0xff]  ;;  %v1521_v57 = vld [vmem:[%s2380_s29 + $0x4f0] sm:$0xff]  ;;  %v2133_v30 = vpack.c.bf16 %v1588_v23, %v1587_v22 }
  0xdb   : > { %v2045_v8 = vpack.c.bf16 %v1496_v63, %v1495_v62  ;;  %v1535_v18 = vld [vmem:[%s2380_s29 + $0x560] sm:$0xff]  ;;  %v1536_v56 = vld [vmem:[%s2380_s29 + $0x568] sm:$0xff]  ;;  %v1537_v2 = vld [vmem:[%s2380_s29 + $0x570] sm:$0xff] }
  0xdc   : > { %v2093_v62 = vpack.c.bf16 %v1536_v56, %v1535_v18  ;;  %v1557_v33 = vld [vmem:[%s2380_s29 + $0x610] sm:$0xff]  ;;  %v1558_v34 = vld [vmem:[%s2380_s29 + $0x618] sm:$0xff]  ;;  %v1575_v38 = vld [vmem:[%s2380_s29 + $0x6a0] sm:$0xff] }
  0xdd   : > { %1998 = vmatpush3.bf16.msra.mxu0 %v1997_v5  ;;  %2030 = vmatpush3.bf16.msra.mxu1 %v2029_v6  ;;  %v1545_v5 = vld [vmem:[%s2380_s29 + $0x5b0] sm:$0xff]  ;;  %v1546_v6 = vld [vmem:[%s2380_s29 + $0x5b8] sm:$0xff]  ;;  %v1576_v39 = vld [vmem:[%s2380_s29 + $0x6a8] sm:$0xff] }
  0xde   : > { %2000 = vmatprep.subr.bf16.mxu0 %v1999_v10  ;;  %2032 = vmatprep.subr.bf16.mxu1 %v2031_v11  ;;  %v2047_v10 = vpack.c.bf16 %v1514_v4, %v1513_v3  ;;  %v1497_v11 = vld [vmem:[%s2380_s29 + $0x430] sm:$0xff]  ;;  %v2079_v16 = vpack.c.bf16 %v1546_v6, %v1545_v5  ;;  %v1538_v4 = vld [vmem:[%s2380_s29 + $0x578] sm:$0xff]  ;;  %v1571_v5 = vld [vmem:[%s2380_s29 + $0x680] sm:$0xff] }
  0xdf   : > { %v1572_v6 = vld [vmem:[%s2380_s29 + $0x688] sm:$0xff]  ;;  %v1590_v37 = vld [vmem:[%s2380_s29 + $0x718] sm:$0xff]  ;;  %v1583_v22 = vld [vmem:[%s2380_s29 + $0x6e0] sm:$0xff] }
  0xe0   : > { %v1594_v18 = vld [vmem:[%s2380_s29 + $0x738] sm:$0xff]  ;;  %v1580_v56 = vld [vmem:[%s2380_s29 + $0x6c8] sm:$0xff] }
  0xe1   : > { %2002 = vmatpush3.bf16.msra.mxu0 %v2001_v24  ;;  %2034 = vmatpush3.bf16.msra.mxu1 %v2033_v25  ;;  %v1547_v24 = vld [vmem:[%s2380_s29 + $0x5c0] sm:$0xff]  ;;  %v1548_v25 = vld [vmem:[%s2380_s29 + $0x5c8] sm:$0xff] }
  0xe2   : > { %2036 = vmatprep.subr.bf16.mxu0 %v2035_v27  ;;  %2068 = vmatprep.subr.bf16.mxu1 %v2067_v28  ;;  %v2049_v27 = vpack.c.bf16 %v1498_v12, %v1497_v11  ;;  %v2081_v28 = vpack.c.bf16 %v1530_v21, %v1529_v15  ;;  %v2083_v35 = vpack.c.bf16 %v1548_v25, %v1547_v24  ;;  %v1555_v15 = vld [vmem:[%s2380_s29 + $0x600] sm:$0xff]  ;;  %v1573_v24 = vld [vmem:[%s2380_s29 + $0x690] sm:$0xff]  ;;  %v1574_v25 = vld [vmem:[%s2380_s29 + $0x698] sm:$0xff] }
  0xe3   : > { %v2097_v11 = vpack.c.bf16 %v1538_v4, %v1537_v2  ;;  %v2099_v12 = vpack.c.bf16 %v1572_v6, %v1571_v5  ;;  %v2103_v36 = vpack.c.bf16 %v1574_v25, %v1573_v24  ;;  %v1596_v2 = vld [vmem:[%s2380_s29 + $0x748] sm:$0xff]  ;;  %v1582_v4 = vld [vmem:[%s2380_s29 + $0x6d8] sm:$0xff]  ;;  %v1613_v5 = vld [vmem:[%s2380_s29 + $0x7d0] sm:$0xff] }
  0xe4   : > { %698 = vmatmul.mubr.f32.vlgmr.msra.gmra.mrb[2].mxu0 %v627_v50  ;;  %810 = vmatmul.mubr.f32.vlgmr.msra.gmra.mrb[2].mxu1 %v739_v51  ;;  %v1552_v50 = vld [vmem:[%s2380_s29 + $0x5e8] sm:$0xff]  ;;  %v1614_v6 = vld [vmem:[%s2380_s29 + $0x7d8] sm:$0xff]  ;;  %v1615_v24 = vld [vmem:[%s2380_s29 + $0x7e0] sm:$0xff] }
  0xe5   : > { %2038 = vmatpush3.bf16.msra.mxu0 %v2037_v17  ;;  %921 = vmatprep.mubr.f32.mxu0 %v854_v20  ;;  %v1502_v17 = vld [vmem:[%s2380_s29 + $0x458] sm:$0xff]  ;;  %v2091_v20 = vpack.c.bf16 %v1552_v50, %v1551_v49  ;;  %v1584_v23 = vld [vmem:[%s2380_s29 + $0x6e8] sm:$0xff] }
  0xe6   : > { %2070 = vmatpush3.bf16.msra.mxu1 %v2069_v46  ;;  %1033 = vmatprep.mubr.f32.mxu1 %v966_v58  ;;  %v1534_v46 = vld [vmem:[%s2380_s29 + $0x558] sm:$0xff]  ;;  %v2057_v51 = vpack.c.bf16 %v1502_v17, %v1501_v44  ;;  %v2107_v17 = vpack.c.bf16 %v1576_v39, %v1575_v38  ;;  %v1616_v25 = vld [vmem:[%s2380_s29 + $0x7e8] sm:$0xff]  ;;  %v1617_v39 = vld [vmem:[%s2380_s29 + $0x7f0] sm:$0xff] }
  0xe7   : > { %2040 = vmatprep.subr.bf16.mxu0 %v2039_v52  ;;  %2072 = vmatprep.subr.bf16.mxu1 %v2071_v53  ;;  %v2089_v52 = vpack.c.bf16 %v1534_v46, %v1533_v19  ;;  %v2059_v53 = vpack.c.bf16 %v1520_v48, %v1519_v47  ;;  %v1522_v58 = vld [vmem:[%s2380_s29 + $0x4f8] sm:$0xff]  ;;  %v1559_v19 = vld [vmem:[%s2380_s29 + $0x620] sm:$0xff]  ;;  %v1577_v47 = vld [vmem:[%s2380_s29 + $0x6b0] sm:$0xff] }
  0xe8   : > { %v2063_v63 = vpack.c.bf16 %v1522_v58, %v1521_v57  ;;  %v1578_v48 = vld [vmem:[%s2380_s29 + $0x6b8] sm:$0xff]  ;;  %v1611_v57 = vld [vmem:[%s2380_s29 + $0x7c0] sm:$0xff]  ;;  %v1612_v58 = vld [vmem:[%s2380_s29 + $0x7c8] sm:$0xff] }
  0xe9   : > { %2042 = vmatpush3.bf16.msra.mxu0 %v2041_v59  ;;  %v1553_v59 = vld [vmem:[%s2380_s29 + $0x5f0] sm:$0xff]  ;;  %v1610_v49 = vld [vmem:[%s2380_s29 + $0x7b8] sm:$0xff] }
  0xea   : > { %2074 = vmatpush3.bf16.msra.mxu1 %v2073_v60  ;;  %2044 = vmatprep.subr.bf16.mxu0 %v2043_v61  ;;  %v1554_v60 = vld [vmem:[%s2380_s29 + $0x5f8] sm:$0xff]  ;;  %v2061_v61 = vpack.c.bf16 %v1504_v55, %v1503_v54  ;;  %v1593_v54 = vld [vmem:[%s2380_s29 + $0x730] sm:$0xff] }
  0xeb   : > { %2076 = vmatprep.subr.bf16.mxu1 %v2075_v1  ;;  %v1506_v1 = vld [vmem:[%s2380_s29 + $0x478] sm:$0xff]  ;;  %v2095_v3 = vpack.c.bf16 %v1554_v60, %v1553_v59  ;;  %v2145_v60 = vpack.c.bf16 %v1594_v18, %v1593_v54 }
  0xec   : > { %v1586_v38 = vld [vmem:[%s2380_s29 + $0x6f8] sm:$0xff] }
  0xed   : > { %2046 = vmatpush3.bf16.msra.mxu0 %v2045_v8  ;;  %v1603_v8 = vld [vmem:[%s2380_s29 + $0x780] sm:$0xff] }
  0xee   : > { %2078 = vmatpush3.bf16.msra.mxu1 %v2077_v9  ;;  %2048 = vmatprep.subr.bf16.mxu0 %v2047_v10  ;;  %v1604_v9 = vld [vmem:[%s2380_s29 + $0x788] sm:$0xff]  ;;  %v2065_v10 = vpack.c.bf16 %v1506_v1, %v1505_v0  ;;  %v1595_v0 = vld [vmem:[%s2380_s29 + $0x740] sm:$0xff]  ;;  %v2147_v1 = vpack.c.bf16 %v1612_v58, %v1611_v57 }
  0xef   : > { %2080 = vmatprep.subr.bf16.mxu1 %v2079_v16  ;;  %v1556_v16 = vld [vmem:[%s2380_s29 + $0x608] sm:$0xff]  ;;  %v2131_v21 = vpack.c.bf16 %v1604_v9, %v1603_v8  ;;  %v2149_v9 = vpack.c.bf16 %v1596_v2, %v1595_v0 }
  0xf1   : > { %2050 = vmatpush3.bf16.msra.mxu0 %v2049_v27  ;;  %v2101_v27 = vpack.c.bf16 %v1556_v16, %v1555_v15  ;;  %v1597_v15 = vld [vmem:[%s2380_s29 + $0x750] sm:$0xff]  ;;  %v2151_v16 = vpack.c.bf16 %v1614_v6, %v1613_v5 }
  0xf2   : > { %2082 = vmatpush3.bf16.msra.mxu1 %v2081_v28  ;;  %2052 = vmatprep.subr.bf16.mxu0 %v2051_v29  ;;  %v1605_v28 = vld [vmem:[%s2380_s29 + $0x790] sm:$0xff]  ;;  %v1606_v29 = vld [vmem:[%s2380_s29 + $0x798] sm:$0xff] }
  0xf3   : > { %2084 = vmatprep.subr.bf16.mxu1 %v2083_v35  ;;  %v1589_v35 = vld [vmem:[%s2380_s29 + $0x710] sm:$0xff]  ;;  %v2135_v40 = vpack.c.bf16 %v1606_v29, %v1605_v28  ;;  %v2123_v29 = vpack.c.bf16 %v1584_v23, %v1583_v22 }
  0xf4   : > { %v2137_v44 = vpack.c.bf16 %v1590_v37, %v1589_v35  ;;  %v2155_v35 = vpack.c.bf16 %v1616_v25, %v1615_v24  ;;  %v1585_v37 = vld [vmem:[%s2380_s29 + $0x6f0] sm:$0xff] }
  0xf5   : > { %2054 = vmatpush3.bf16.msra.mxu0 %v2053_v41  ;;  %v1607_v41 = vld [vmem:[%s2380_s29 + $0x7a0] sm:$0xff] }
  0xf6   : > { %2086 = vmatpush3.bf16.msra.mxu1 %v2085_v42  ;;  %2056 = vmatprep.subr.bf16.mxu0 %v2055_v43  ;;  %v1608_v42 = vld [vmem:[%s2380_s29 + $0x7a8] sm:$0xff]  ;;  %v2105_v43 = vpack.c.bf16 %v1558_v34, %v1557_v33  ;;  %v1599_v34 = vld [vmem:[%s2380_s29 + $0x760] sm:$0xff] }
  0xf7   : > { %2088 = vmatprep.subr.bf16.mxu1 %v2087_v45  ;;  %v1560_v45 = vld [vmem:[%s2380_s29 + $0x628] sm:$0xff]  ;;  %v2139_v46 = vpack.c.bf16 %v1608_v42, %v1607_v41 }
  0xf8   : > { %v2109_v50 = vpack.c.bf16 %v1560_v45, %v1559_v19  ;;  %v1568_v33 = vld [vmem:[%s2380_s29 + $0x668] sm:$0xff]  ;;  %v1601_v45 = vld [vmem:[%s2380_s29 + $0x770] sm:$0xff] }
  0xf9   : > { %2058 = vmatpush3.bf16.msra.mxu0 %v2057_v51  ;;  %v2111_v51 = vpack.c.bf16 %v1578_v48, %v1577_v47 }
  0xfa   : > { %2090 = vmatpush3.bf16.msra.mxu1 %v2089_v52  ;;  %2060 = vmatprep.subr.bf16.mxu0 %v2059_v53  ;;  %v1561_v52 = vld [vmem:[%s2380_s29 + $0x630] sm:$0xff]  ;;  %v1562_v53 = vld [vmem:[%s2380_s29 + $0x638] sm:$0xff] }
  0xfb   : > { %2092 = vmatprep.subr.bf16.mxu1 %v2091_v20  ;;  %v1579_v20 = vld [vmem:[%s2380_s29 + $0x6c0] sm:$0xff]  ;;  %v2113_v59 = vpack.c.bf16 %v1562_v53, %v1561_v52 }
  0xfd   : > { %2062 = vmatpush3.bf16.msra.mxu0 %v2061_v61  ;;  %v2115_v61 = vpack.c.bf16 %v1580_v56, %v1579_v20 }
  0xfe   : > { %2094 = vmatpush3.bf16.msra.mxu1 %v2093_v62  ;;  %2064 = vmatprep.subr.bf16.mxu0 %v2063_v63  ;;  %v1563_v62 = vld [vmem:[%s2380_s29 + $0x640] sm:$0xff]  ;;  %v1564_v63 = vld [vmem:[%s2380_s29 + $0x648] sm:$0xff] }
  0xff   : > { %2096 = vmatprep.subr.bf16.mxu1 %v2095_v3  ;;  %v1581_v3 = vld [vmem:[%s2380_s29 + $0x6d0] sm:$0xff]  ;;  %v2117_v8 = vpack.c.bf16 %v1564_v63, %v1563_v62 }
 0x101   : > { %2066 = vmatpush3.bf16.msra.mxu0 %v2065_v10  ;;  %v2119_v10 = vpack.c.bf16 %v1582_v4, %v1581_v3 }
 0x102   : > { %2098 = vmatpush3.bf16.msra.mxu1 %v2097_v11  ;;  %2100 = vmatprep.subr.bf16.mxu0 %v2099_v12  ;;  %v1565_v11 = vld [vmem:[%s2380_s29 + $0x650] sm:$0xff]  ;;  %v1566_v12 = vld [vmem:[%s2380_s29 + $0x658] sm:$0xff] }
 0x103   : > { %2132 = vmatprep.subr.bf16.mxu1 %v2131_v21  ;;  %v1598_v21 = vld [vmem:[%s2380_s29 + $0x758] sm:$0xff] }
 0x104   : > { %922 = vmatmul.mubr.f32.vlgmr.msra.gmra.mrb[4].mxu0 %v2514_v7  ;;  %v1591_v7 = vld [vmem:[%s2380_s29 + $0x720] sm:$0xff]  ;;  %v2153_v28 = vpack.c.bf16 %v1598_v21, %v1597_v15 }
 0x105   : > { %1034 = vmatmul.mubr.f32.vlgmr.msra.gmra.mrb[4].mxu1 %v2522_v13  ;;  %2102 = vmatpush3.bf16.msra.mxu0 %v2101_v27  ;;  %v1592_v13 = vld [vmem:[%s2380_s29 + $0x728] sm:$0xff]  ;;  %v2121_v27 = vpack.c.bf16 %v1566_v12, %v1565_v11  ;;  %v1620_v12 = vld [vmem:[%s2769_s3] ss:$0 sm:$0xff] (!%p1619_p11) }
 0x106   : > { %1145 = vmatprep.mubr.f32.mxu0 %v2525_v14  ;;  %2134 = vmatpush3.bf16.msra.mxu1 %v2133_v30  ;;  %v1609_v14 = vld [vmem:[%s2380_s29 + $0x7b0] sm:$0xff]  ;;  %v1567_v30 = vld [vmem:[%s2380_s29 + $0x660] sm:$0xff] }
 0x107   : > { %1257 = vmatprep.mubr.f32.mxu1 %v2533_v26  ;;  %2104 = vmatprep.subr.bf16.mxu0 %v2103_v36  ;;  %v2141_v26 = vpack.c.bf16 %v1592_v13, %v1591_v7  ;;  %v2143_v55 = vpack.c.bf16 %v1610_v49, %v1609_v14  ;;  %v1600_v36 = vld [vmem:[%s2380_s29 + $0x768] sm:$0xff]  ;;  %v2125_v41 = vpack.c.bf16 %v1568_v33, %v1567_v30  ;;  %v1602_v7 = vld [vmem:[%s2380_s29 + $0x778] sm:$0xff] }
 0x108   : > { %2136 = vmatprep.subr.bf16.mxu1 %v2135_v40  ;;  %v1618_v40 = vld [vmem:[%s2380_s29 + $0x7f8] sm:$0xff]  ;;  %v2157_v42 = vpack.c.bf16 %v1600_v36, %v1599_v34  ;;  %v2161_v13 = vpack.c.bf16 %v1602_v7, %v1601_v45 }
 0x109   : > { %2106 = vmatpush3.bf16.msra.mxu0 %v2105_v43  ;;  %v2127_v43 = vpack.c.bf16 %v1586_v38, %v1585_v37  ;;  %v2159_v19 = vpack.c.bf16 %v1618_v40, %v1617_v39 }
 0x10a   : > { %2138 = vmatpush3.bf16.msra.mxu1 %v2137_v44  ;;  %2108 = vmatprep.subr.bf16.mxu0 %v2107_v17  ;;  %v1569_v44 = vld [vmem:[%s2380_s29 + $0x670] sm:$0xff]  ;;  %v1570_v17 = vld [vmem:[%s2380_s29 + $0x678] sm:$0xff] }
 0x10b   : > { %2140 = vmatprep.subr.bf16.mxu1 %v2139_v46  ;;  %v2129_v46 = vpack.c.bf16 %v1570_v17, %v1569_v44 }
 0x10d   : > { %2110 = vmatpush3.bf16.msra.mxu0 %v2109_v50 }
 0x10e   : > { %2142 = vmatpush3.bf16.msra.mxu1 %v2141_v26  ;;  %2112 = vmatprep.subr.bf16.mxu0 %v2111_v51 }
 0x10f   : > { %2144 = vmatprep.subr.bf16.mxu1 %v2143_v55 }
 0x111   : > { %2114 = vmatpush3.bf16.msra.mxu0 %v2113_v59 }
 0x112   : > { %2146 = vmatpush3.bf16.msra.mxu1 %v2145_v60  ;;  %2116 = vmatprep.subr.bf16.mxu0 %v2115_v61 }
 0x113   : > { %2148 = vmatprep.subr.bf16.mxu1 %v2147_v1 }
 0x115   : > { %2118 = vmatpush3.bf16.msra.mxu0 %v2117_v8  ;;  %v1264_v8 = vld [vmem:[#allocation2] sm:$0x3] }
 0x116   : > { %2150 = vmatpush3.bf16.msra.mxu1 %v2149_v9  ;;  %2120 = vmatprep.subr.bf16.mxu0 %v2119_v10 }
 0x117   : > { %2152 = vmatprep.subr.bf16.mxu1 %v2151_v16 }
 0x119   : > { %2122 = vmatpush3.bf16.msra.mxu0 %v2121_v27 }
 0x11a   : > { %2154 = vmatpush3.bf16.msra.mxu1 %v2153_v28  ;;  %2124 = vmatprep.subr.bf16.mxu0 %v2123_v29 }
 0x11b   : > { %2156 = vmatprep.subr.bf16.mxu1 %v2155_v35 }
 0x11d   : > { %2126 = vmatpush3.bf16.msra.mxu0 %v2125_v41 }
 0x11e   : > { %2158 = vmatpush3.bf16.msra.mxu1 %v2157_v42  ;;  %2128 = vmatprep.subr.bf16.mxu0 %v2127_v43 }
 0x11f   : > { %2160 = vmatprep.subr.bf16.mxu1 %v2159_v19 }
 0x121   : > { %2130 = vmatpush3.bf16.msra.mxu0 %v2129_v46 }
 0x122   : > { %2162 = vmatpush3.bf16.msra.mxu1 %v2161_v13 }
 0x124   : > { %1146 = vmatmul.mubr.f32.vlgmr.msra.gmra.mrb[6].mxu0 %v2540_v31 }
 0x125   : > { %1258 = vmatmul.mubr.f32.vlgmr.msra.gmra.mrb[6].mxu1 %v2543_v32 }
 0x197   : > { %v1659_v47 = vpop.f32.mrb[0].mxu0  ;;  %v1694_v48 = vpop.f32.mrb[0].mxu1 }
 0x198   : > { %v1660_v14 = vpop.f32.mrb[1].mxu0  ;;  %v1695_v49 = vpop.f32.mrb[1].mxu1 }
 0x199   : > { %v1661_v50 = vadd.f32 %v1660_v14, %v1659_v47  ;;  %v1696_v26 = vadd.f32 %v1695_v49, %v1694_v48 }
 0x19b   : > { %v589_v51 = vadd.f32 %v1696_v26, %v1661_v50 }
 0x1b7   : > { %v1729_v52 = vpop.f32.mrb[2].mxu0  ;;  %v1764_v53 = vpop.f32.mrb[2].mxu1 }
 0x1b8   : > { %v1730_v54 = vpop.f32.mrb[3].mxu0  ;;  %v1765_v55 = vpop.f32.mrb[3].mxu1 }
 0x1b9   : > { %v1731_v18 = vadd.f32 %v1730_v54, %v1729_v52  ;;  %v1766_v20 = vadd.f32 %v1765_v55, %v1764_v53 }
 0x1bb   : > { %v703_v56 = vadd.f32 %v1731_v18, %v589_v51 }
 0x1bd   : > { %v815_v57 = vadd.f32 %v1766_v20, %v703_v56 }
 0x1d7   : > { %v1799_v58 = vpop.f32.mrb[4].mxu0 }
 0x1d8   : > { %v1834_v59 = vpop.f32.mrb[4].mxu1  ;;  %v1800_v31 = vpop.f32.mrb[5].mxu0 }
 0x1d9   : > { %v1801_v60 = vadd.f32 %v1800_v31, %v1799_v58  ;;  %v1835_v32 = vpop.f32.mrb[5].mxu1 }
 0x1da   : > { %v1836_v61 = vadd.f32 %v1835_v32, %v1834_v59 }
 0x1db   : > { %v927_v62 = vadd.f32 %v1801_v60, %v815_v57 }
 0x1dd   : > { %v1039_v63 = vadd.f32 %v1836_v61, %v927_v62 }
 0x1f7   : > { %v1869_v0 = vpop.f32.mrb[6].mxu0 }
 0x1f8   : > { %v1904_v1 = vpop.f32.mrb[6].mxu1  ;;  %v1870_v2 = vpop.f32.mrb[7].mxu0 }
 0x1f9   : > { %v1871_v3 = vadd.f32 %v1870_v2, %v1869_v0  ;;  %v1905_v4 = vpop.f32.mrb[7].mxu1 }
 0x1fa   : > { %v1906_v5 = vadd.f32 %v1905_v4, %v1904_v1 }
 0x1fb   : > { %v1151_v6 = vadd.f32 %v1871_v3, %v1039_v63  ;;  %1271 = sbr.rel (%p1619_p11) target bundleno = 524 (0x20c), region = 105 }
 0x1fd   : > { %v1263_v9 = vadd.f32 %v1906_v5, %v1151_v6 }
 0x1ff   : > { %v1265_v10 = vadd.f32 %v1264_v8, %v1263_v9 }
 0x201   : > { %1267 = vst.msk [vmem:[#allocation2] sm:$0x3] %vm1266_vm2, %v1265_v10 }
 0x208   : > { %v1272_v11 = vld [vmem:[#allocation2] sm:$0x3] }
 0x209   : > { %v1280_v15 = vadd.f32 %v1620_v12, %v1272_v11 }
 0x20b   : > { %1281 = vst.msk [vmem:[#allocation5] sm:$0x3] %vm1266_vm2, %v1280_v15 }
 0x20c PF: > { %p2725_p12 = scmp.eq.s32.totalorder %s1380_s20, 1  ;;  %s2290_s8 = smov [#allocation5]  }
 0x20d   : > { %s1291_s9 = sshll.u32 %s2290_s8, 4  ;;  %s1292_s9 = int_to_ptr.vmem [resolvable:$true] %s1291_s9 }
 0x20e   : > { %s2217_s17 = scalar_lea.vmem %s1292_s9, 32  ;;  %p2224_p2 = scmp.lt.s32.totalorder %s1292_s9, %s1292_s9 }
 0x20f   : > { %p2218_p13 = scmp.ne.s32.totalorder %s1292_s9, %s2217_s17  ;;  %p2225_p3 = scmp.lt.s32.totalorder %s2217_s17, %s2217_s17 }
 0x211   : > { %p2219_p0 = pnand %p2218_p13, %p2725_p12  ;;  %p2226_p4 = por %p2225_p3, %p2224_p2 }
 0x213   : > { %p2220_p1 = pneg %p2219_p0 }
 0x215   : > { %p2227_p5 = pnand %p2226_p4, %p2220_p1 }
 0x217   : > { %2230 = shalt.err (!%p2227_p5)
}
 0x218   : > { %s2231_s20 = scalar_lea.hbm %s2770_s4, 32 }
 0x219   : > { %p2232_p6 = scmp.ne.s32.totalorder %s2770_s4, %s2231_s20  ;;  %p2237_p9 = scmp.lt.u32.totalorder %s2231_s20, %s2770_s4 }
 0x21b   : > { %p2233_p7 = pnand %p2232_p6, %p2725_p12 }
 0x21d   : > { %p2234_p8 = pneg %p2233_p7 }
 0x21f   : > { %p2239_p10 = pnand %p2237_p9, %p2234_p8 }
 0x221   : > { %2242 = shalt.err (!%p2239_p10)
}
 0x222   : > { %2164 = dma.vmem_to_hbm [thread:$0]  (%p2725_p12), %s1292_s9, 32, %s2770_s4, [#allocation6]  }
 0x223   : > { %2264 = dma.done.wait (%p2725_p12), [#allocation6], 32  }
 0x224   : > { %2266 = vsyncadd (%p2725_p12), [#allocation6], 4294967264 }
 0x225 PF: > { %s15_s19 = sadd.s32 1, %s2285_s19   ;;  %s2773_s15 = smov %s2273_s16 }
 0x226   : > { %p12_p11 = scmp.ge.s32.totalorder %s15_s19, 4   ;;  %s2774_s16 = smov %s2356_s25 }
 0x227   : > { %s2775_s17 = smov %s2281_s18  ;;  %s2776_s18 = smov %s2778_s21 }
 0x228   :  { %14 = sbr.rel (!%p12_p11) target bundleno = 3 (0x3), region = 156 }
 0x22f   :  { %1304 = vsyncpa [#allocation6], 1 }
 0x230   :  { %1306 = vsyncpa [#allocation6 + $0x1], 1 }

</bundles_post_ra>
